<compile_context>
chip_gen: v7x
topology: tpu7x:2x2x1
jax: 0.10.0
libtpu: 0.0.40
codegen_flags: <defaults>
</compile_context>

<pallas_src>
import functools

import jax
import jax.numpy as jnp
from jax.experimental import pallas as pl
from jax.experimental.pallas import tpu as pltpu


LANE = 128
SUBLANE = 8
MAX_TILE_B = 1024  # VMEM use at this tile: x 2*128 KiB + out 2*512 KiB + ~144 KiB weights


def _round_up(x, m):
    return (x + m - 1) // m * m


def _choose_tile_b(B):
    """Pick a batch tile: large (amortize per-step overhead), multiple of 8,
    and giving >= 2 grid steps when the batch allows (v7x has 2 TCs/chip)."""
    Bp8 = _round_up(B, SUBLANE)
    if Bp8 >= 2 * MAX_TILE_B:
        return MAX_TILE_B
    if Bp8 >= 2 * SUBLANE:
        # split into two tiles so both TensorCores get work on v7x
        return _round_up(pl.cdiv(Bp8, 2), SUBLANE)
    return SUBLANE


def mlp_kernel(x_ref, w1_ref, b1_ref, w2_ref, b2_ref, w3_ref, b3_ref, o_ref):
    """Fused 3-layer MLP forward on one batch tile (all weights resident in VMEM)."""
    x = x_ref[...]
    h1 = jnp.dot(x, w1_ref[...], preferred_element_type=jnp.float32) + b1_ref[...]
    h1 = jnp.maximum(h1, 0.0)
    h2 = jnp.dot(h1, w2_ref[...], preferred_element_type=jnp.float32) + b2_ref[...]
    h2 = jnp.maximum(h2, 0.0)
    z = jnp.dot(h2, w3_ref[...], preferred_element_type=jnp.float32) + b3_ref[...]
    o_ref[...] = jax.nn.sigmoid(z)


def pad_params(params):
    """One-time padding of weights/biases to lane-aligned shapes.

    Weights are [in_features, out_features]; only the hidden/output feature dims
    are padded to 128 lanes (the input feature dim of w1 is left as-is to match
    the un-padded x). The zero padding keeps the math exact.
    """
    w1, b1 = params["w1"], params["b1"]
    w2, b2 = params["w2"], params["b2"]
    w3, b3 = params["w3"], params["b3"]
    D_in, H1 = w1.shape
    H2 = w2.shape[1]
    D_out = w3.shape[1]
    H1p = _round_up(H1, LANE)
    H2p = _round_up(H2, LANE)
    Op = _round_up(D_out, LANE)

    return {
        "w1p": jnp.zeros((D_in, H1p), jnp.float32).at[:, :H1].set(w1),
        "b1p": jnp.zeros((1, H1p), jnp.float32).at[0, :H1].set(b1),
        "w2p": jnp.zeros((H1p, H2p), jnp.float32).at[:H1, :H2].set(w2),
        "b2p": jnp.zeros((1, H2p), jnp.float32).at[0, :H2].set(b2),
        "w3p": jnp.zeros((H2p, Op), jnp.float32).at[:H2, :D_out].set(w3),
        "b3p": jnp.zeros((1, Op), jnp.float32).at[0, :D_out].set(b3),
        "dims": (D_in, H1, H2, D_out),
    }


@functools.partial(jax.jit, static_argnames=("tile_b", "d_out"))
def _mlp_forward_padded(x, w1p, b1p, w2p, b2p, w3p, b3p, *, tile_b, d_out):
    """x: [B, D_in] f32 (feature dim NOT padded). Padded weights resident in VMEM."""
    B, D_in = x.shape
    H1p = w1p.shape[1]
    H2p = w2p.shape[1]
    Op = w3p.shape[1]

    Bp = _round_up(max(B, tile_b), tile_b)
    if Bp != B:
        xp = jnp.zeros((Bp, D_in), jnp.float32).at[:B].set(x)
    else:
        xp = x  # no batch-pad copy when tiling already fits

    grid = (Bp // tile_b,)

    out_p = pl.pallas_call(
        mlp_kernel,
        out_shape=jax.ShapeDtypeStruct((Bp, Op), jnp.float32),
        grid_spec=pltpu.PrefetchScalarGridSpec(
            num_scalar_prefetch=0,
            grid=grid,
            in_specs=[
                pl.BlockSpec((tile_b, D_in), lambda i: (i, 0)),   # x tile (full feat dim)
                pl.BlockSpec((D_in, H1p), lambda i: (0, 0)),      # w1 (resident)
                pl.BlockSpec((1, H1p), lambda i: (0, 0)),         # b1
                pl.BlockSpec((H1p, H2p), lambda i: (0, 0)),       # w2
                pl.BlockSpec((1, H2p), lambda i: (0, 0)),         # b2
                pl.BlockSpec((H2p, Op), lambda i: (0, 0)),        # w3
                pl.BlockSpec((1, Op), lambda i: (0, 0)),          # b3
            ],
            out_specs=pl.BlockSpec((tile_b, Op), lambda i: (i, 0)),
        ),
        compiler_params=pltpu.CompilerParams(
            dimension_semantics=("parallel",),
        ),
    )(xp, w1p, b1p, w2p, b2p, w3p, b3p)

    return out_p[:B, :d_out]


def mlp_forward(x, padded_params, tile_b=None):
    """Forward pass. `padded_params` must come from pad_params()."""
    x = x.astype(jnp.float32)
    B = x.shape[0]
    if tile_b is None:
        tile_b = _choose_tile_b(B)
    d_out = padded_params["dims"][3]
    return _mlp_forward_padded(
        x,
        padded_params["w1p"], padded_params["b1p"],
        padded_params["w2p"], padded_params["b2p"],
        padded_params["w3p"], padded_params["b3p"],
        tile_b=tile_b, d_out=d_out,
    )


def init_params(key, input_size, hidden_size_1=50, hidden_size_2=5, output_size=1):
    """Deterministic init mimicking torch.nn.Linear (U(-1/sqrt(fan_in), +1/sqrt(fan_in)))."""
    ks = jax.random.split(key, 6)

    def lin(kw, kb, fan_in, fan_out):
        bound = 1.0 / jnp.sqrt(fan_in)
        w = jax.random.uniform(kw, (fan_in, fan_out), jnp.float32, -bound, bound)
        b = jax.random.uniform(kb, (fan_out,), jnp.float32, -bound, bound)
        return w, b

    w1, b1 = lin(ks[0], ks[1], input_size, hidden_size_1)
    w2, b2 = lin(ks[2], ks[3], hidden_size_1, hidden_size_2)
    w3, b3 = lin(ks[4], ks[5], hidden_size_2, output_size)
    return {"w1": w1, "b1": b1, "w2": w2, "b2": b2, "w3": w3, "b3": b3}


def mlp_reference(x, p):
    h1 = jnp.maximum(x @ p["w1"] + p["b1"], 0.0)
    h2 = jnp.maximum(h1 @ p["w2"] + p["b2"], 0.0)
    return jax.nn.sigmoid(h2 @ p["w3"] + p["b3"])


if __name__ == "__main__":
    key = jax.random.PRNGKey(0)
    k_x, k_p = jax.random.split(key)

    batch, input_size = 2, 32
    x = jax.random.normal(k_x, (batch, input_size), jnp.float32)
    params = init_params(k_p, input_size, hidden_size_1=50, hidden_size_2=5, output_size=1)

    # One-time weight padding (kept outside the per-call forward path).
    padded = pad_params(params)

    out = mlp_forward(x, padded)
    out = jax.block_until_ready(out)

    ref = mlp_reference(x, params)
    assert out.shape == (batch, 1), out.shape
    assert jnp.allclose(out, ref, atol=1e-5, rtol=1e-5), (out, ref)

    # Exercise a larger, multi-tile batch as well (checks the big-tile path).
    xb = jax.random.normal(k_x, (300, input_size), jnp.float32)
    outb = jax.block_until_ready(mlp_forward(xb, padded))
    refb = mlp_reference(xb, params)
    assert outb.shape == (300, 1), outb.shape
    assert jnp.allclose(outb, refb, atol=1e-5, rtol=1e-5)

    print("KERNEL_OK")
</pallas_src>

<mosaic_0001>
module attributes {stable_mosaic.version = 11 : i64} {
  func.func @mlp_kernel(%arg0: i32, %arg1: memref<8x32xf32, #tpu.memory_space<vmem>>, %arg2: memref<32x128xf32, #tpu.memory_space<vmem>>, %arg3: memref<1x128xf32, #tpu.memory_space<vmem>>, %arg4: memref<128x128xf32, #tpu.memory_space<vmem>>, %arg5: memref<1x128xf32, #tpu.memory_space<vmem>>, %arg6: memref<128x128xf32, #tpu.memory_space<vmem>>, %arg7: memref<1x128xf32, #tpu.memory_space<vmem>>, %arg8: memref<8x128xf32, #tpu.memory_space<vmem>>) attributes {dimension_semantics = [#tpu.dimension_semantics<parallel>], iteration_bounds = array<i64: 1>, scalar_prefetch = 0 : i64, scratch_operands = 0 : i64, tpu.core_type = #tpu.core_type<tc>, window_params = [{transform_indices = @transform_0, window_bounds = array<i64: 8, 32>}, {pipeline_mode = #tpu.pipeline_mode<synchronous>, transform_indices = @transform_1, window_bounds = array<i64: 32, 128>}, {pipeline_mode = #tpu.pipeline_mode<synchronous>, transform_indices = @transform_2, window_bounds = array<i64: 1, 128>}, {pipeline_mode = #tpu.pipeline_mode<synchronous>, transform_indices = @transform_3, window_bounds = array<i64: 128, 128>}, {pipeline_mode = #tpu.pipeline_mode<synchronous>, transform_indices = @transform_4, window_bounds = array<i64: 1, 128>}, {pipeline_mode = #tpu.pipeline_mode<synchronous>, transform_indices = @transform_5, window_bounds = array<i64: 128, 128>}, {pipeline_mode = #tpu.pipeline_mode<synchronous>, transform_indices = @transform_6, window_bounds = array<i64: 1, 128>}, {transform_indices = @transform_7, window_bounds = array<i64: 8, 128>}]} {
    %c0 = arith.constant 0 : index
    %c0_0 = arith.constant 0 : index
    %0 = vector.load %arg1[%c0, %c0_0] : memref<8x32xf32, #tpu.memory_space<vmem>>, vector<8x32xf32>
    %c0_1 = arith.constant 0 : index
    %c0_2 = arith.constant 0 : index
    %1 = vector.load %arg2[%c0_1, %c0_2] : memref<32x128xf32, #tpu.memory_space<vmem>>, vector<32x128xf32>
    %cst = arith.constant dense<0.000000e+00> : vector<8x128xf32>
    %2 = tpu.matmul %0, %1, %cst {dimension_numbers = #tpu.dot_dimension_numbers<[1], [0], [0], [1], [0, 0, 1, 1], [], []>} : vector<8x32xf32>, vector<32x128xf32>, vector<8x128xf32> -> vector<8x128xf32>
    %c0_3 = arith.constant 0 : index
    %c0_4 = arith.constant 0 : index
    %3 = vector.load %arg3[%c0_3, %c0_4] : memref<1x128xf32, #tpu.memory_space<vmem>>, vector<1x128xf32>
    %4 = vector.broadcast %3 : vector<1x128xf32> to vector<8x128xf32>
    %5 = arith.addf %2, %4 : vector<8x128xf32>
    %cst_5 = arith.constant 0.000000e+00 : f32
    %6 = vector.broadcast %cst_5 : f32 to vector<8x128xf32>
    %7 = arith.maximumf %5, %6 : vector<8x128xf32>
    %c0_6 = arith.constant 0 : index
    %c0_7 = arith.constant 0 : index
    %8 = vector.load %arg4[%c0_6, %c0_7] : memref<128x128xf32, #tpu.memory_space<vmem>>, vector<128x128xf32>
    %cst_8 = arith.constant dense<0.000000e+00> : vector<8x128xf32>
    %9 = tpu.matmul %7, %8, %cst_8 {dimension_numbers = #tpu.dot_dimension_numbers<[1], [0], [0], [1], [0, 0, 1, 1], [], []>} : vector<8x128xf32>, vector<128x128xf32>, vector<8x128xf32> -> vector<8x128xf32>
    %c0_9 = arith.constant 0 : index
    %c0_10 = arith.constant 0 : index
    %10 = vector.load %arg5[%c0_9, %c0_10] : memref<1x128xf32, #tpu.memory_space<vmem>>, vector<1x128xf32>
    %11 = vector.broadcast %10 : vector<1x128xf32> to vector<8x128xf32>
    %12 = arith.addf %9, %11 : vector<8x128xf32>
    %cst_11 = arith.constant 0.000000e+00 : f32
    %13 = vector.broadcast %cst_11 : f32 to vector<8x128xf32>
    %14 = arith.maximumf %12, %13 : vector<8x128xf32>
    %c0_12 = arith.constant 0 : index
    %c0_13 = arith.constant 0 : index
    %15 = vector.load %arg6[%c0_12, %c0_13] : memref<128x128xf32, #tpu.memory_space<vmem>>, vector<128x128xf32>
    %cst_14 = arith.constant dense<0.000000e+00> : vector<8x128xf32>
    %16 = tpu.matmul %14, %15, %cst_14 {dimension_numbers = #tpu.dot_dimension_numbers<[1], [0], [0], [1], [0, 0, 1, 1], [], []>} : vector<8x128xf32>, vector<128x128xf32>, vector<8x128xf32> -> vector<8x128xf32>
    %c0_15 = arith.constant 0 : index
    %c0_16 = arith.constant 0 : index
    %17 = vector.load %arg7[%c0_15, %c0_16] : memref<1x128xf32, #tpu.memory_space<vmem>>, vector<1x128xf32>
    %18 = vector.broadcast %17 : vector<1x128xf32> to vector<8x128xf32>
    %19 = arith.addf %16, %18 : vector<8x128xf32>
    %20 = arith.negf %19 : vector<8x128xf32>
    %21 = math.exp %20 : vector<8x128xf32>
    %cst_17 = arith.constant 1.000000e+00 : f32
    %22 = vector.broadcast %cst_17 : f32 to vector<8x128xf32>
    %23 = arith.addf %22, %21 : vector<8x128xf32>
    %24 = arith.divf %22, %23 : vector<8x128xf32>
    %c0_18 = arith.constant 0 : index
    %c0_19 = arith.constant 0 : index
    %25 = vector.load %arg8[%c0_18, %c0_19] : memref<8x128xf32, #tpu.memory_space<vmem>>, vector<8x128xf32>
    tpu.vector_store %arg8[%c0_18, %c0_19], %24 {strides = array<i32>} : memref<8x128xf32, #tpu.memory_space<vmem>>, vector<8x128xf32>,
    return
  }
  func.func @transform_0(%arg0: i32) -> (i32, i32) {
    %c0_i32 = arith.constant 0 : i32
    %c0_i32_0 = arith.constant 0 : i32
    return %arg0, %c0_i32 : i32, i32
  }
  func.func @transform_1(%arg0: i32) -> (i32, i32) {
    %c0_i32 = arith.constant 0 : i32
    %c0_i32_0 = arith.constant 0 : i32
    %c0_i32_1 = arith.constant 0 : i32
    return %c0_i32, %c0_i32_0 : i32, i32
  }
  func.func @transform_2(%arg0: i32) -> (i32, i32) {
    %c0_i32 = arith.constant 0 : i32
    %c0_i32_0 = arith.constant 0 : i32
    %c0_i32_1 = arith.constant 0 : i32
    return %c0_i32, %c0_i32_0 : i32, i32
  }
  func.func @transform_3(%arg0: i32) -> (i32, i32) {
    %c0_i32 = arith.constant 0 : i32
    %c0_i32_0 = arith.constant 0 : i32
    %c0_i32_1 = arith.constant 0 : i32
    return %c0_i32, %c0_i32_0 : i32, i32
  }
  func.func @transform_4(%arg0: i32) -> (i32, i32) {
    %c0_i32 = arith.constant 0 : i32
    %c0_i32_0 = arith.constant 0 : i32
    %c0_i32_1 = arith.constant 0 : i32
    return %c0_i32, %c0_i32_0 : i32, i32
  }
  func.func @transform_5(%arg0: i32) -> (i32, i32) {
    %c0_i32 = arith.constant 0 : i32
    %c0_i32_0 = arith.constant 0 : i32
    %c0_i32_1 = arith.constant 0 : i32
    return %c0_i32, %c0_i32_0 : i32, i32
  }
  func.func @transform_6(%arg0: i32) -> (i32, i32) {
    %c0_i32 = arith.constant 0 : i32
    %c0_i32_0 = arith.constant 0 : i32
    %c0_i32_1 = arith.constant 0 : i32
    return %c0_i32, %c0_i32_0 : i32, i32
  }
  func.func @transform_7(%arg0: i32) -> (i32, i32) {
    %c0_i32 = arith.constant 0 : i32
    %c0_i32_0 = arith.constant 0 : i32
    return %arg0, %c0_i32 : i32, i32
  }
}

</mosaic_0001>

<bundles_post_ra>
// kernel: _mlp_forward_padded.1
= control target key start
LH: loop header
LB: loop body
LE: loop exit
PB: predicated region body
PF: predicated region fallthrough
CT: control target
= control target key end

     0   :  { %12 = vsyncpa [#allocation3], 0  ;;  %s751_s0 = inlined_call_operand.vmem [shape: f32[8,32], index: 0, kind: input, shape index: {}]   ;;  %s752_s1 = inlined_call_operand.hbm [shape: f32[32,128], index: 1, kind: input, shape index: {}]   ;;  %s753_s2 = inlined_call_operand.vmem [shape: f32[1,128], index: 2, kind: input, shape index: {}]   ;;  %s754_s3 = inlined_call_operand.hbm [shape: f32[128,128], index: 3, kind: input, shape index: {}]   ;;  %s755_s4 = inlined_call_operand.vmem [shape: f32[1,128], index: 4, kind: input, shape index: {}]   ;;  %s756_s5 = inlined_call_operand.hbm [shape: f32[128,128], index: 5, kind: input, shape index: {}]   ;;  %s757_s6 = inlined_call_operand.vmem [shape: f32[1,128], index: 6, kind: input, shape index: {}]   ;;  %s758_s7 = inlined_call_operand.vmem [shape: f32[8,128], index: 7, kind: output, shape index: {}]  }
   0x1   :  { %13 = vsyncpa [#allocation5], 0  ;;  %s615_s24 = smov [#allocation4]   ;;  %s616_s26 = smov [#allocation2]  }
   0x2   :  { %s35_s25 = sshll.u32 %s615_s24, 4  ;;  %s21_s27 = sshll.u32 %s616_s26, 4  ;;  %s36_s25 = int_to_ptr.vmem [resolvable:$true] %s35_s25  ;;  %s663_s27 = int_to_ptr.vmem [resolvable:$true] %s21_s27 }
   0x3   :  { %s545_s30 = scalar_lea.hbm %s754_s3, 2048 }
   0x4   :  { %p546_p0 = scmp.ne.s32.totalorder %s754_s3, %s545_s30  ;;  %p549_p1 = scmp.lt.u32.totalorder %s545_s30, %s754_s3 }
   0x6   :  { %p551_p2 = pnand %p549_p1, %p546_p0 }
   0x8   :  { %554 = shalt.err (!%p551_p2)
}
   0x9   :  { %s555_s12 = scalar_lea.vmem %s36_s25, 2048  ;;  %p560_p4 = scmp.lt.s32.totalorder %s36_s25, %s36_s25 }
   0xa   :  { %p556_p3 = scmp.ne.s32.totalorder %s36_s25, %s555_s12  ;;  %p561_p5 = scmp.lt.s32.totalorder %s555_s12, %s555_s12 }
   0xc   :  { %p562_p6 = por %p561_p5, %p560_p4 }
   0xe   :  { %p563_p7 = pnand %p562_p6, %p556_p3 }
  0x10   :  { %566 = shalt.err (!%p563_p7)
}
  0x11   :  { %s617_s13 = smov 128   ;;  %s618_s14 = smov 8  }
  0x12   :  { %41 = dma.hbm_to_vmem [thread:$0]  %s754_s3, 2048, %s36_s25, [#allocation5], %s617_s13, %s617_s13, %s618_s14  }
  0x13   :  { %s567_s19 = scalar_lea.hbm %s752_s1, 512 }
  0x14   :  { %p568_p8 = scmp.ne.s32.totalorder %s752_s1, %s567_s19  ;;  %p571_p9 = scmp.lt.u32.totalorder %s567_s19, %s752_s1 }
  0x16   :  { %p573_p10 = pnand %p571_p9, %p568_p8 }
  0x18   :  { %576 = shalt.err (!%p573_p10)
}
  0x19   :  { %s577_s24 = scalar_lea.vmem %s663_s27, 512  ;;  %p582_p12 = scmp.lt.s32.totalorder %s663_s27, %s663_s27 }
  0x1a   :  { %p578_p11 = scmp.ne.s32.totalorder %s663_s27, %s577_s24  ;;  %p583_p13 = scmp.lt.s32.totalorder %s577_s24, %s577_s24 }
  0x1c   :  { %p584_p0 = por %p583_p13, %p582_p12 }
  0x1e   :  { %p585_p1 = pnand %p584_p0, %p578_p11 }
  0x20   :  { %588 = shalt.err (!%p585_p1)
}
  0x21   :  { %27 = dma.hbm_to_vmem [thread:$0]  %s752_s1, 512, %s663_s27, [#allocation3], %s617_s13, %s617_s13, %s618_s14  }
  0x22   :  { %s619_s26 = smov [#allocation6]   ;;  %s589_s8 = scalar_lea.hbm %s756_s5, 2048 }
  0x23   :  { %s49_s28 = sshll.u32 %s619_s26, 4  ;;  %p590_p2 = scmp.ne.s32.totalorder %s756_s5, %s589_s8  ;;  %s50_s28 = int_to_ptr.vmem [resolvable:$true] %s49_s28 }
  0x24   :  { %p593_p3 = scmp.lt.u32.totalorder %s589_s8, %s756_s5 }
  0x26   :  { %p595_p4 = pnand %p593_p3, %p590_p2 }
  0x28   :  { %598 = shalt.err (!%p595_p4)
}
  0x29   :  { %s599_s15 = scalar_lea.vmem %s50_s28, 2048  ;;  %p604_p6 = scmp.lt.s32.totalorder %s50_s28, %s50_s28 }
  0x2a   :  { %p600_p5 = scmp.ne.s32.totalorder %s50_s28, %s599_s15  ;;  %p605_p7 = scmp.lt.s32.totalorder %s599_s15, %s599_s15 }
  0x2c   :  { %p606_p8 = por %p605_p7, %p604_p6 }
  0x2e   :  { %p607_p9 = pnand %p606_p8, %p600_p5 }
  0x30   :  { %610 = shalt.err (!%p607_p9)
}
  0x31   :  { %55 = dma.hbm_to_vmem [thread:$0]  %s756_s5, 2048, %s50_s28, [#allocation5], %s617_s13, %s617_s13, %s618_s14  }
  0x32   :  { %611 = dma.done.wait [#allocation3], 512  }
  0x33   :  { %612 = vsyncadd [#allocation3], 4294966784 }
  0x34   :  { %613 = dma.done.wait [#allocation5], 4096  }
  0x35   :  { %614 = vsyncadd [#allocation5], 4294963200  ;;  %v620_v0 = vmov 0.0|0.0   ;;  %vm621_vm0 = vmmov 0   ;;  %v622_v1 = vmov 0.0   ;;  %v68_v2 = vld [vmem:[#allocation2] sm:$0xff] }
  0x36   :  { %479 = vmatprep.subr.bf16.mxu0 %v620_v0  ;;  %406 = vmatprep.mubr.msk.f32.mxu0 %vm621_vm0, %v622_v1  ;;  %v69_v3 = vld [vmem:[#allocation2 + $0x8] sm:$0xff]  ;;  %v70_v4 = vld [vmem:[#allocation2 + $0x10] sm:$0xff]  ;;  %v71_v6 = vld [vmem:[#allocation2 + $0x18] sm:$0xff]  ;;  %vm79_vm1 = vcmask 261120  }
  0x37   :  { %485 = vmatprep.subr.bf16.mxu1 %v620_v0  ;;  %441 = vmatprep.mubr.msk.f32.mxu1 %vm621_vm0, %v622_v1  ;;  %v480_v5 = vpack.c.bf16 %v69_v3, %v68_v2  ;;  %v154_v7 = vld [vmem:[#allocation4] sm:$0xff]  ;;  %v155_v8 = vld [vmem:[#allocation4 + $0x8] sm:$0xff]  ;;  %v156_v9 = vld [vmem:[#allocation4 + $0x10] sm:$0xff]  ;;  %v483_v11 = vpack.c.bf16 %v71_v6, %v70_v4 }
  0x38   :  { %v157_v10 = vld [vmem:[#allocation4 + $0x18] sm:$0xff]  ;;  %v486_v12 = vpack.c.bf16 %v155_v8, %v154_v7  ;;  %v158_v14 = vld [vmem:[#allocation4 + $0x20] sm:$0xff]  ;;  %v159_v15 = vld [vmem:[#allocation4 + $0x28] sm:$0xff] }
  0x39   :  { %481 = vmatpush3.bf16.msra.mxu0 %v480_v5  ;;  %v489_v13 = vpack.c.bf16 %v157_v10, %v156_v9  ;;  %v67_v16 = vld [vmem:[%s751_s0] sm:$0xff]  ;;  %v492_v17 = vpack.c.bf16 %v159_v15, %v158_v14  ;;  %v160_v18 = vld [vmem:[#allocation4 + $0x30] sm:$0xff]  ;;  %v161_v19 = vld [vmem:[#allocation4 + $0x38] sm:$0xff] }
  0x3a   :  { %482 = vmatprep.subr.bf16.mxu0 %v620_v0  ;;  %487 = vmatpush3.bf16.msra.mxu1 %v486_v12  ;;  %v495_v20 = vpack.c.bf16 %v161_v19, %v160_v18  ;;  %v162_v21 = vld [vmem:[#allocation4 + $0x40] sm:$0xff]  ;;  %v163_v22 = vld [vmem:[#allocation4 + $0x48] sm:$0xff]  ;;  %v164_v24 = vld [vmem:[#allocation4 + $0x50] sm:$0xff] }
  0x3b   :  { %488 = vmatprep.subr.bf16.mxu1 %v620_v0  ;;  %v498_v23 = vpack.c.bf16 %v163_v22, %v162_v21  ;;  %v165_v25 = vld [vmem:[#allocation4 + $0x58] sm:$0xff]  ;;  %v166_v27 = vld [vmem:[#allocation4 + $0x60] sm:$0xff]  ;;  %v167_v28 = vld [vmem:[#allocation4 + $0x68] sm:$0xff] }
  0x3c   :  { %v501_v26 = vpack.c.bf16 %v165_v25, %v164_v24  ;;  %v504_v29 = vpack.c.bf16 %v167_v28, %v166_v27  ;;  %v168_v30 = vld [vmem:[#allocation4 + $0x70] sm:$0xff]  ;;  %v169_v31 = vld [vmem:[#allocation4 + $0x78] sm:$0xff]  ;;  %v248_v33 = vld [vmem:[#allocation6] sm:$0xff] }
  0x3d   :  { %484 = vmatpush3.bf16.msra.mxu0 %v483_v11  ;;  %v507_v32 = vpack.c.bf16 %v169_v31, %v168_v30  ;;  %v249_v34 = vld [vmem:[#allocation6 + $0x8] sm:$0xff]  ;;  %v250_v35 = vld [vmem:[#allocation6 + $0x10] sm:$0xff]  ;;  %v251_v37 = vld [vmem:[#allocation6 + $0x18] sm:$0xff] }
  0x3e   :  { %509 = vmatprep.subr.bf16.mxu0 %v620_v0  ;;  %490 = vmatpush3.bf16.msra.mxu1 %v489_v13  ;;  %v510_v36 = vpack.c.bf16 %v249_v34, %v248_v33  ;;  %v513_v38 = vpack.c.bf16 %v251_v37, %v250_v35  ;;  %v252_v39 = vld [vmem:[#allocation6 + $0x20] sm:$0xff]  ;;  %v253_v40 = vld [vmem:[#allocation6 + $0x28] sm:$0xff]  ;;  %v254_v42 = vld [vmem:[#allocation6 + $0x30] sm:$0xff] }
  0x3f   :  { %491 = vmatprep.subr.bf16.mxu1 %v620_v0  ;;  %v516_v41 = vpack.c.bf16 %v253_v40, %v252_v39  ;;  %v255_v43 = vld [vmem:[#allocation6 + $0x38] sm:$0xff]  ;;  %v256_v45 = vld [vmem:[#allocation6 + $0x40] sm:$0xff]  ;;  %v257_v46 = vld [vmem:[#allocation6 + $0x48] sm:$0xff] }
  0x40   :  { %407 = vmatmul.mubr.msk.f32.vlgmr.msra.gmra.mrb[0].mxu0 %vm79_vm1, %v67_v16  ;;  %v519_v44 = vpack.c.bf16 %v255_v43, %v254_v42  ;;  %v522_v47 = vpack.c.bf16 %v257_v46, %v256_v45  ;;  %v258_v48 = vld [vmem:[#allocation6 + $0x50] sm:$0xff]  ;;  %v259_v49 = vld [vmem:[#allocation6 + $0x58] sm:$0xff]  ;;  %v260_v51 = vld [vmem:[#allocation6 + $0x60] sm:$0xff] }
  0x41   :  { %476 = vmatprep.mubr.msk.f32.mxu0 %vm621_vm0, %v622_v1  ;;  %511 = vmatpush3.bf16.msra.mxu0 %v510_v36  ;;  %v525_v50 = vpack.c.bf16 %v259_v49, %v258_v48  ;;  %v261_v52 = vld [vmem:[#allocation6 + $0x68] sm:$0xff]  ;;  %v354_v54 = vld [vmem:[%s753_s2] ss:$0 sm:$0xff]  ;;  %v262_v59 = vld [vmem:[#allocation6 + $0x70] sm:$0xff] }
  0x42   :  { %493 = vmatpush3.bf16.msra.mxu1 %v492_v17  ;;  %512 = vmatprep.subr.bf16.mxu0 %v620_v0  ;;  %v528_v53 = vpack.c.bf16 %v261_v52, %v260_v51  ;;  %v263_v60 = vld [vmem:[#allocation6 + $0x78] sm:$0xff]  ;;  %v356_v62 = vld [vmem:[%s755_s4] ss:$0 sm:$0xff] }
  0x43   :  { %494 = vmatprep.subr.bf16.mxu1 %v620_v0  ;;  %v531_v61 = vpack.c.bf16 %v263_v60, %v262_v59  ;;  %v357_v3 = vld [vmem:[%s757_s6] ss:$0 sm:$0xff] }
  0x45   :  { %514 = vmatpush3.bf16.msra.mxu0 %v513_v38 }
  0x46   :  { %496 = vmatpush3.bf16.msra.mxu1 %v495_v20  ;;  %515 = vmatprep.subr.bf16.mxu0 %v620_v0 }
  0x47   :  { %497 = vmatprep.subr.bf16.mxu1 %v620_v0 }
  0x49   :  { %517 = vmatpush3.bf16.msra.mxu0 %v516_v41 }
  0x4a   :  { %499 = vmatpush3.bf16.msra.mxu1 %v498_v23  ;;  %518 = vmatprep.subr.bf16.mxu0 %v620_v0 }
  0x4b   :  { %500 = vmatprep.subr.bf16.mxu1 %v620_v0 }
  0x4d   :  { %520 = vmatpush3.bf16.msra.mxu0 %v519_v44 }
  0x4e   :  { %502 = vmatpush3.bf16.msra.mxu1 %v501_v26  ;;  %521 = vmatprep.subr.bf16.mxu0 %v620_v0 }
  0x4f   :  { %503 = vmatprep.subr.bf16.mxu1 %v620_v0 }
  0x51   :  { %523 = vmatpush3.bf16.msra.mxu0 %v522_v47 }
  0x52   :  { %505 = vmatpush3.bf16.msra.mxu1 %v504_v29  ;;  %524 = vmatprep.subr.bf16.mxu0 %v620_v0 }
  0x53   :  { %506 = vmatprep.subr.bf16.mxu1 %v620_v0 }
  0x55   :  { %526 = vmatpush3.bf16.msra.mxu0 %v525_v50 }
  0x56   :  { %508 = vmatpush3.bf16.msra.mxu1 %v507_v32  ;;  %527 = vmatprep.subr.bf16.mxu0 %v620_v0 }
  0x59   :  { %529 = vmatpush3.bf16.msra.mxu0 %v528_v53 }
  0x5a   :  { %530 = vmatprep.subr.bf16.mxu0 %v620_v0 }
  0x5d   :  { %532 = vmatpush3.bf16.msra.mxu0 %v531_v61 }
 0x113   :  { %v149_v55 = vpop.f32.mrb[0].mxu0 }
 0x114   :  { %v150_v56 = vadd.f32 %v354_v54, %v149_v55  ;;  %v408_v57 = vpop.f32.mrb[1].mxu0 }
 0x116   :  { %v153_v58 = vmax.f32 %v150_v56, 0.0 }
 0x118   :  { %442 = vmatmul.mubr.f32.vlgmr.msra.gmra.mrb[0].mxu1 %v153_v58 }
 0x1eb   :  { %v243_v63 = vpop.f32.mrb[0].mxu1 }
 0x1ec   :  { %v244_v1 = vadd.f32 %v356_v62, %v243_v63  ;;  %v443_v0 = vpop.f32.mrb[1].mxu1 }
 0x1ee   :  { %v247_v2 = vmax.f32 %v244_v1, 0.0 }
 0x1f0   :  { %477 = vmatmul.mubr.f32.vlgmr.msra.gmra.mrb[2].mxu0 %v247_v2 }
 0x2c3   :  { %v337_v4 = vpop.f32.mrb[2].mxu0 }
 0x2c4   :  { %v338_v5 = vadd.f32 %v357_v3, %v337_v4  ;;  %v478_v6 = vpop.f32.mrb[3].mxu0 }
 0x2c6   :  { %v358_v7 = vmul.f32 -1.442695, %v338_v5 }
 0x2c8   :  { %541 = vpow2.f32 %v358_v7 }
 0x2d2   :  { %v542_v8 = vpop.eup %541 }
 0x2d3   :  { %v344_v9 = vadd.f32 1.0, %v542_v8 }
 0x2d5   :  { %543 = vrcp.f32 %v344_v9 }
 0x2df   :  { %v544_v10 = vpop.eup %543 }
 0x2e0   :  { %347 = vst [vmem:[%s758_s7] sm:$0xff] %v544_v10 }
 0x2e1   :  { %352 = vsyncpa [#allocation3], 1 }
 0x2e2   :  { %353 = vsyncpa [#allocation5], 1 }

</bundles_post_ra>
